<compile_context>
chip_gen: v7x
topology: tpu7x:2x2x1
jax: 0.10.0
libtpu: 0.0.40
codegen_flags: <defaults>
</compile_context>

<pallas_src>
import functools

import jax
import jax.numpy as jnp
import numpy as np
from jax.experimental import pallas as pl
from jax.experimental.pallas import tpu as pltpu

LANE = 128     # lane width: last-dim padding granularity
SUBLANE = 8    # sublane width: row-tile granularity (f32)


def _round_up(v, m):
    return ((v + m - 1) // m) * m


# ----------------------------------------------------------------------------
# Fused MLP kernel: one row-tile of x, all weights/biases VMEM-resident.
#   refs = (x_ref, w0_ref, b0_ref, w1_ref, b1_ref, ..., o_ref)
# ----------------------------------------------------------------------------
def _fused_mlp_kernel(n_layers, use_bf16, *refs):
    x_ref = refs[0]
    o_ref = refs[-1]
    wb = refs[1:-1]

    h = x_ref[...]                                   # (TM, din_pad) float32
    for i in range(n_layers):
        w = wb[2 * i][...]                           # (din_pad_i, dout_pad_i)
        b = wb[2 * i + 1][...]                       # (1, dout_pad_i) float32
        lhs = h.astype(w.dtype) if use_bf16 else h   # bf16 operands, f32 accum
        y = jnp.dot(lhs, w, preferred_element_type=jnp.float32) + b
        h = jnp.maximum(y, 0.0)                      # ReLU after every Linear
    o_ref[...] = h.astype(o_ref.dtype)


# ----------------------------------------------------------------------------
# Wrapper: pad to lane-dense shapes, tile rows, single pallas_call.
# ----------------------------------------------------------------------------
def generic_node_encoder(x, params, *, use_bf16=True, row_tile=512):
    """Forward pass of GenericNodeEncoder.

    x:      (N, feat_dim) array (any float dtype; cast to f32 once, as in torch).
    params: list of (W_t, b) with W_t shape (in_dim, out_dim), b shape (out_dim,).
    """
    n, feat_dim = x.shape
    n_layers = len(params)
    x = x.astype(jnp.float32)                         # single cast (torch .float())

    in_dims = [w.shape[0] for w, _ in params]
    out_dims = [w.shape[1] for w, _ in params]
    assert in_dims[0] == feat_dim

    # Lane-dense (multiple-of-128) feature dims.
    in_pad = [_round_up(d, LANE) for d in in_dims]
    out_pad = [_round_up(d, LANE) for d in out_dims]

    # Row tiling over nodes (multiple of 8; bounded by row_tile to keep the
    # activation tiles well under VMEM on v7x's 64 MiB as well).
    tm = _round_up(min(row_tile, _round_up(n, SUBLANE)), SUBLANE)
    n_padded = _round_up(n, tm)
    grid = (n_padded // tm,)

    # Zero-pad activations and parameters.
    xp = jnp.pad(x, ((0, n_padded - n), (0, in_pad[0] - feat_dim)))
    w_dtype = jnp.bfloat16 if use_bf16 else jnp.float32

    flat_inputs = [xp]
    in_specs = [pl.BlockSpec((tm, in_pad[0]), lambda i: (i, 0))]
    for li, (w, b) in enumerate(params):
        wp = jnp.pad(
            w.astype(jnp.float32),
            ((0, in_pad[li] - in_dims[li]), (0, out_pad[li] - out_dims[li])),
        ).astype(w_dtype)
        bp = jnp.pad(
            b.astype(jnp.float32).reshape(1, -1),
            ((0, 0), (0, out_pad[li] - out_dims[li])),
        )
        flat_inputs.extend([wp, bp])
        # Constant index maps -> fetched once, VMEM-resident across the grid.
        in_specs.append(pl.BlockSpec(wp.shape, lambda i: (0, 0)))
        in_specs.append(pl.BlockSpec(bp.shape, lambda i: (0, 0)))

    out_spec = pl.BlockSpec((tm, out_pad[-1]), lambda i: (i, 0))

    kernel = functools.partial(_fused_mlp_kernel, n_layers, use_bf16)
    y = pl.pallas_call(
        kernel,
        out_shape=jax.ShapeDtypeStruct((n_padded, out_pad[-1]), jnp.float32),
        grid_spec=pltpu.PrefetchScalarGridSpec(
            num_scalar_prefetch=0,
            grid=grid,
            in_specs=in_specs,
            out_specs=out_spec,
        ),
        compiler_params=pltpu.CompilerParams(
            dimension_semantics=("parallel",),       # row tiles are independent
        ),
    )(*flat_inputs)

    return y[:n, : out_dims[-1]]


# ----------------------------------------------------------------------------
# Parameter construction (matches the PyTorch __init__ logic)
# ----------------------------------------------------------------------------
def make_params(key, emb_dim, feat_dim, n_layers=1):
    spread_layers = [
        min(emb_dim, feat_dim) + int(np.abs(feat_dim - emb_dim)) * i
        for i in range(n_layers - 1)
    ]
    layer_sizes = [feat_dim] + spread_layers + [emb_dim]
    params = []
    for i in range(n_layers):
        fan_in, fan_out = layer_sizes[i], layer_sizes[i + 1]
        key, sub = jax.random.split(key)
        # xavier_uniform_ on the (out, in) weight: bound = sqrt(6/(fan_in+fan_out))
        bound = float(np.sqrt(6.0 / (fan_in + fan_out)))
        w = jax.random.uniform(
            sub, (fan_out, fan_in), dtype=jnp.float32, minval=-bound, maxval=bound
        )
        b = jnp.zeros((fan_out,), dtype=jnp.float32)         # bias.data.fill_(0.0)
        params.append((w.T, b))                               # stored as (in, out)
    return params


# Pure-JAX references for the sanity checks.
def _reference(x, params, use_bf16):
    h = x.astype(jnp.float32)
    for w_t, b in params:
        if use_bf16:
            y = jnp.dot(
                h.astype(jnp.bfloat16),
                w_t.astype(jnp.bfloat16),
                preferred_element_type=jnp.float32,
            )
        else:
            y = jnp.dot(h, w_t, preferred_element_type=jnp.float32)
        h = jnp.maximum(y + b, 0.0)
    return h


# ----------------------------------------------------------------------------
# Demo
# ----------------------------------------------------------------------------
if __name__ == "__main__":
    key = jax.random.PRNGKey(0)
    k_x, k_p = jax.random.split(key)

    feat_dim = 16
    emb_dim = 32
    n_layers = 2
    n_nodes = 272          # not a multiple of the row tile -> exercises padding
    row_tile = 128         # small tile so the demo runs a multi-step grid

    x = jax.random.normal(k_x, (n_nodes, feat_dim), dtype=jnp.float32)
    params = make_params(k_p, emb_dim, feat_dim, n_layers)

    out = generic_node_encoder(x, params, use_bf16=True, row_tile=row_tile)
    out = jax.block_until_ready(out)
    assert out.shape == (n_nodes, emb_dim)

    # Tight check vs. a reference with matching bf16-operand / f32-accumulate math.
    ref_bf16 = _reference(x, params, use_bf16=True)
    np.testing.assert_allclose(np.asarray(out), np.asarray(ref_bf16),
                               rtol=1e-5, atol=1e-5)

    # Loose check vs. the exact-f32 PyTorch semantics (bf16 operand rounding).
    ref_f32 = _reference(x, params, use_bf16=False)
    np.testing.assert_allclose(np.asarray(out), np.asarray(ref_f32),
                               rtol=5e-2, atol=5e-2)

    # Exact-f32 path (use_bf16=False) matches the PyTorch reference tightly.
    out_f32 = jax.block_until_ready(
        generic_node_encoder(x, params, use_bf16=False, row_tile=row_tile)
    )
    np.testing.assert_allclose(np.asarray(out_f32), np.asarray(ref_f32),
                               rtol=1e-5, atol=1e-5)

    print("KERNEL_OK")
</pallas_src>

<mosaic_0001>
module attributes {stable_mosaic.version = 11 : i64} {
  func.func @_fused_mlp_kernel(%arg0: i32, %arg1: memref<128x128xf32, #tpu.memory_space<vmem>>, %arg2: memref<128x128xbf16, #tpu.memory_space<vmem>>, %arg3: memref<1x128xf32, #tpu.memory_space<vmem>>, %arg4: memref<128x128xbf16, #tpu.memory_space<vmem>>, %arg5: memref<1x128xf32, #tpu.memory_space<vmem>>, %arg6: memref<128x128xf32, #tpu.memory_space<vmem>>) attributes {dimension_semantics = [#tpu.dimension_semantics<parallel>], iteration_bounds = array<i64: 3>, scalar_prefetch = 0 : i64, scratch_operands = 0 : i64, tpu.core_type = #tpu.core_type<tc>, window_params = [{transform_indices = @transform_0, window_bounds = array<i64: 128, 128>}, {pipeline_mode = #tpu.pipeline_mode<synchronous>, transform_indices = @transform_1, window_bounds = array<i64: 128, 128>}, {pipeline_mode = #tpu.pipeline_mode<synchronous>, transform_indices = @transform_2, window_bounds = array<i64: 1, 128>}, {pipeline_mode = #tpu.pipeline_mode<synchronous>, transform_indices = @transform_3, window_bounds = array<i64: 128, 128>}, {pipeline_mode = #tpu.pipeline_mode<synchronous>, transform_indices = @transform_4, window_bounds = array<i64: 1, 128>}, {transform_indices = @transform_5, window_bounds = array<i64: 128, 128>}]} {
    %c0 = arith.constant 0 : index
    %c0_0 = arith.constant 0 : index
    %0 = vector.load %arg1[%c0, %c0_0] : memref<128x128xf32, #tpu.memory_space<vmem>>, vector<128x128xf32>
    %c0_1 = arith.constant 0 : index
    %c0_2 = arith.constant 0 : index
    %1 = vector.load %arg2[%c0_1, %c0_2] : memref<128x128xbf16, #tpu.memory_space<vmem>>, vector<128x128xbf16>
    %c0_3 = arith.constant 0 : index
    %c0_4 = arith.constant 0 : index
    %2 = vector.load %arg3[%c0_3, %c0_4] : memref<1x128xf32, #tpu.memory_space<vmem>>, vector<1x128xf32>
    %3 = arith.truncf %0 : vector<128x128xf32> to vector<128x128xbf16>
    %cst = arith.constant dense<0.000000e+00> : vector<128x128xf32>
    %4 = tpu.matmul %3, %1, %cst {dimension_numbers = #tpu.dot_dimension_numbers<[1], [0], [0], [1], [0, 0, 1, 1], [], []>} : vector<128x128xbf16>, vector<128x128xbf16>, vector<128x128xf32> -> vector<128x128xf32>
    %5 = vector.broadcast %2 : vector<1x128xf32> to vector<128x128xf32>
    %6 = arith.addf %4, %5 : vector<128x128xf32>
    %cst_5 = arith.constant 0.000000e+00 : f32
    %7 = vector.broadcast %cst_5 : f32 to vector<128x128xf32>
    %8 = arith.maximumf %6, %7 : vector<128x128xf32>
    %c0_6 = arith.constant 0 : index
    %c0_7 = arith.constant 0 : index
    %9 = vector.load %arg4[%c0_6, %c0_7] : memref<128x128xbf16, #tpu.memory_space<vmem>>, vector<128x128xbf16>
    %c0_8 = arith.constant 0 : index
    %c0_9 = arith.constant 0 : index
    %10 = vector.load %arg5[%c0_8, %c0_9] : memref<1x128xf32, #tpu.memory_space<vmem>>, vector<1x128xf32>
    %11 = arith.truncf %8 : vector<128x128xf32> to vector<128x128xbf16>
    %cst_10 = arith.constant dense<0.000000e+00> : vector<128x128xf32>
    %12 = tpu.matmul %11, %9, %cst_10 {dimension_numbers = #tpu.dot_dimension_numbers<[1], [0], [0], [1], [0, 0, 1, 1], [], []>} : vector<128x128xbf16>, vector<128x128xbf16>, vector<128x128xf32> -> vector<128x128xf32>
    %13 = vector.broadcast %10 : vector<1x128xf32> to vector<128x128xf32>
    %14 = arith.addf %12, %13 : vector<128x128xf32>
    %cst_11 = arith.constant 0.000000e+00 : f32
    %15 = vector.broadcast %cst_11 : f32 to vector<128x128xf32>
    %16 = arith.maximumf %14, %15 : vector<128x128xf32>
    %c0_12 = arith.constant 0 : index
    %c0_13 = arith.constant 0 : index
    %17 = vector.load %arg6[%c0_12, %c0_13] : memref<128x128xf32, #tpu.memory_space<vmem>>, vector<128x128xf32>
    tpu.vector_store %arg6[%c0_12, %c0_13], %16 {strides = array<i32>} : memref<128x128xf32, #tpu.memory_space<vmem>>, vector<128x128xf32>,
    return
  }
  func.func @transform_0(%arg0: i32) -> (i32, i32) {
    %c0_i32 = arith.constant 0 : i32
    %c0_i32_0 = arith.constant 0 : i32
    return %arg0, %c0_i32 : i32, i32
  }
  func.func @transform_1(%arg0: i32) -> (i32, i32) {
    %c0_i32 = arith.constant 0 : i32
    %c0_i32_0 = arith.constant 0 : i32
    %c0_i32_1 = arith.constant 0 : i32
    return %c0_i32, %c0_i32_0 : i32, i32
  }
  func.func @transform_2(%arg0: i32) -> (i32, i32) {
    %c0_i32 = arith.constant 0 : i32
    %c0_i32_0 = arith.constant 0 : i32
    %c0_i32_1 = arith.constant 0 : i32
    return %c0_i32, %c0_i32_0 : i32, i32
  }
  func.func @transform_3(%arg0: i32) -> (i32, i32) {
    %c0_i32 = arith.constant 0 : i32
    %c0_i32_0 = arith.constant 0 : i32
    %c0_i32_1 = arith.constant 0 : i32
    return %c0_i32, %c0_i32_0 : i32, i32
  }
  func.func @transform_4(%arg0: i32) -> (i32, i32) {
    %c0_i32 = arith.constant 0 : i32
    %c0_i32_0 = arith.constant 0 : i32
    %c0_i32_1 = arith.constant 0 : i32
    return %c0_i32, %c0_i32_0 : i32, i32
  }
  func.func @transform_5(%arg0: i32) -> (i32, i32) {
    %c0_i32 = arith.constant 0 : i32
    %c0_i32_0 = arith.constant 0 : i32
    return %arg0, %c0_i32 : i32, i32
  }
}

</mosaic_0001>

<bundles_post_ra>
// kernel: tpu_custom_call.1
= control target key start
LH: loop header
LB: loop body
LE: loop exit
PB: predicated region body
PF: predicated region fallthrough
CT: control target
= control target key end

     0   :  { %10 = vsyncpa [#allocation3], 0  ;;  %s1490_s0 = inlined_call_operand.hbm [shape: f32[384,128], index: 0, kind: input, shape index: {}]   ;;  %s1491_s1 = inlined_call_operand.hbm [shape: bf16[128,128], index: 1, kind: input, shape index: {}]   ;;  %s1492_s2 = inlined_call_operand.vmem [shape: f32[1,128], index: 2, kind: input, shape index: {}]   ;;  %s1493_s3 = inlined_call_operand.hbm [shape: bf16[128,128], index: 3, kind: input, shape index: {}]   ;;  %s1494_s4 = inlined_call_operand.vmem [shape: f32[1,128], index: 4, kind: input, shape index: {}]   ;;  %s1495_s5 = inlined_call_operand.hbm [shape: f32[384,128], index: 5, kind: output, shape index: {}]  }
   0x1   :  { %12 = vsyncpa [#allocation3 + $0x1], 0 }
   0x2   :  { %13 = vsyncpa [#allocation6], 0 }
   0x3   :  { %14 = vsyncpa [#allocation4], 0 }
   0x4   :  { %16 = vsyncpa [#allocation4 + $0x1], 0  ;;  %s1218_s18 = smov 0   ;;  %s1220_s19 = smov 0  }
   0x5   :  { %s1222_s20 = smov 0   ;;  %s1224_s21 = smov 0  }
   0x6 LB: > { %s1239_s22 = sadd.s32 4294967295, %s1176_s21   ;;  %s797_s23 = sadd.s32 4294967294, %s1176_s21   ;;  %s1176_s21 = sphi %s1224_s21, %s1514_s21   ;;  %s1172_s20 = sphi %s1222_s20, %s1513_s20   ;;  %s1168_s19 = sphi %s1220_s19, %s1512_s19   ;;  %s1164_s18 = sphi %s1218_s18, %s1511_s18  }
   0x7   : > { %p42_p0 = scmp.ne.s32.totalorder %s1168_s19, %s1164_s18  ;;  %p1496_p1 = scmp.eq.s32.totalorder %s1239_s22, 0 }
   0x8   : > { %p156_p3 = scmp.eq.s32.totalorder %s797_s23, 2  ;;  %p798_p5 = scmp.ge.s32.totalorder %s1176_s21, 1 }
   0x9   : > { %p1248_p4 = por %p1496_p1, %p42_p0  ;;  %p163_p7 = scmp.lt.s32.totalorder %s1176_s21, 4 }
   0xa   : > { %p1253_p6 = por %p156_p3, %p42_p0  ;;  %s1178_s27 = smov [#allocation5]  }
   0xb   : > { %s1499_s24 = scalar_select %p1248_p4, 1, 0 }
   0xc   : > { %s1500_s25 = scalar_select %p1253_p6, 1, 0 }
   0xd   : > { %p1258_p8 = pnand %p798_p5, %p163_p7  ;;  %s175_s28 = sshll.u32 %s1178_s27, 4  ;;  %s176_s28 = int_to_ptr.vmem [resolvable:$true] %s175_s28 }
   0xe   : > { %s1179_s30 = smov [#allocation7]   ;;  %s1020_s9 = scalar_lea.hbm %s1491_s1, 1024 }
   0xf   : > { %s1501_s26 = scalar_select %p1258_p8, 1, 0 }
  0x10   : > { %p943_p9 = pneg %p1258_p8  ;;  %s191_s6 = sshll.u32 %s1179_s30, 4  ;;  %s1270_s6 = int_to_ptr.vmem [resolvable:$true] %s191_s6 }
  0x11   : > { %p1021_p11 = scmp.ne.s32.totalorder %s1491_s1, %s1020_s9  ;;  %p1027_p3 = scmp.lt.u32.totalorder %s1020_s9, %s1491_s1 }
  0x12   : > { %p1266_p10 = pnand %p943_p9, %p1496_p1 }
  0x14   : > { %p1022_p12 = pneg %p1266_p10 }
  0x16   : > { %p1023_p13 = pnand %p1022_p12, %p1021_p11 }
  0x18   : > { %p1024_p0 = pneg %p1023_p13 }
  0x1a   : > { %p1029_p5 = pnand %p1027_p3, %p1024_p0 }
  0x1c   : > { %1032 = shalt.err (!%p1029_p5)
}
  0x1d   : > { %s1033_s14 = scalar_lea.vmem %s176_s28, 1024  ;;  %p1041_p2 = scmp.lt.s32.totalorder %s176_s28, %s176_s28 }
  0x1e   : > { %p1034_p7 = scmp.ne.s32.totalorder %s176_s28, %s1033_s14  ;;  %p1042_p6 = scmp.lt.s32.totalorder %s1033_s14, %s1033_s14 }
  0x20   : > { %p1036_p9 = pnand %p1034_p7, %p1022_p12  ;;  %p1043_p4 = por %p1042_p6, %p1041_p2 }
  0x22   : > { %p1037_p1 = pneg %p1036_p9 }
  0x24   : > { %p1044_p8 = pnand %p1043_p4, %p1037_p1 }
  0x26   : > { %1047 = shalt.err (!%p1044_p8)
}
  0x27   : > { %s1180_s15 = smov 64   ;;  %s1181_s16 = smov 4  }
  0x28   : > { %946 = dma.hbm_to_vmem [thread:$0]  (!%p1266_p10), %s1491_s1, 1024, %s176_s28, [#allocation6], %s1180_s15, %s1180_s15, %s1181_s16  }
  0x29   : > { %s1048_s7 = scalar_lea.hbm %s1493_s3, 1024 }
  0x2a   : > { %p1049_p11 = scmp.ne.s32.totalorder %s1493_s3, %s1048_s7  ;;  %p1055_p4 = scmp.lt.u32.totalorder %s1048_s7, %s1493_s3 }
  0x2c   : > { %p1051_p1 = pnand %p1049_p11, %p1022_p12 }
  0x2e   : > { %p1052_p2 = pneg %p1051_p1 }
  0x30   : > { %p1057_p6 = pnand %p1055_p4, %p1052_p2 }
  0x32   : > { %1060 = shalt.err (!%p1057_p6)
}
  0x33   : > { %s1061_s28 = scalar_lea.vmem %s1270_s6, 1024  ;;  %p1069_p3 = scmp.lt.s32.totalorder %s1270_s6, %s1270_s6 }
  0x34   : > { %p1062_p8 = scmp.ne.s32.totalorder %s1270_s6, %s1061_s28  ;;  %p1070_p5 = scmp.lt.s32.totalorder %s1061_s28, %s1061_s28 }
  0x36   : > { %p1064_p13 = pnand %p1062_p8, %p1022_p12  ;;  %p1071_p7 = por %p1070_p5, %p1069_p3 }
  0x38   : > { %p1065_p0 = pneg %p1064_p13 }
  0x3a   : > { %p1072_p9 = pnand %p1071_p7, %p1065_p0 }
  0x3c   : > { %1075 = shalt.err (!%p1072_p9)
}
  0x3d   : > { %949 = dma.hbm_to_vmem [thread:$0]  (!%p1266_p10), %s1493_s3, 1024, %s1270_s6, [#allocation6], %s1180_s15, %s1180_s15, %s1181_s16  }
  0x3e   : > { %s1320_s14 = sadd.s32 1, %s1176_s21   ;;  %s29_s29 = sadd.s32 1, %s1172_s20 }
  0x3f   : > { %s26_s17 = ssub.s32 %s1176_s21, %s1320_s14  ;;  %p36_p12 = scmp.ne.s32.totalorder %s1172_s20, %s1168_s19 }
  0x40   : > { %p27_p11 = scmp.eq.s32.totalorder %s26_s17, 0  ;;  %p37_p1 = scmp.eq.s32.totalorder %s1176_s21, 0 }
  0x41   : > { %p1503_p2 = scmp.eq.s32.totalorder %s1239_s22, 2  ;;  %p960_p6 = scmp.lt.s32.totalorder %s1176_s21, 3 }
  0x42   : > { %s1336_s27 = scalar_select %p27_p11, %s1172_s20, %s29_s29  }
  0x43   : > { %p1330_p4 = por %p1503_p2, %p36_p12  ;;  %p38_p8 = por %p37_p1, %p36_p12 }
  0x44   : > { %s208_s30 = sand.u32 1, %s1172_s20   ;;  %s833_s6 = sshll.u32 %s1176_s21, 11 }
  0x45   : > { %s802_s7 = sshll.u32 %s208_s30, 7  ;;  %s1343_s8 = scalar_lea.hbm %s1490_s0, %s833_s6 }
  0x46   : > { %s212_s9 = scalar_lea.vmem [#allocation2], %s802_s7  ;;  %p1347_p10 = pnand %p960_p6, %p38_p8 }
  0x47   : > { %s219_s10 = sshll.u32 %s212_s9, 4  ;;  %s1351_s28 = scalar_lea.sflag [#allocation3], %s208_s30  ;;  %s1345_s10 = int_to_ptr.vmem [resolvable:$true] %s219_s10 }
  0x48   : > { %s1076_s12 = scalar_lea.hbm %s1343_s8, 2048  ;;  %p1078_p0 = pneg %p1347_p10 }
  0x49   : > { %p1077_p13 = scmp.ne.s32.totalorder %s1343_s8, %s1076_s12  ;;  %s1081_s17 = scalar_lea.hbm %s1490_s0, 6144 }
  0x4a   : > { %p1082_p7 = scmp.lt.u32.totalorder %s1343_s8, %s1490_s0  ;;  %p1083_p9 = scmp.lt.u32.totalorder %s1081_s17, %s1076_s12 }
  0x4b   : > { %p1079_p3 = pnand %p1078_p0, %p1077_p13  ;;  %p1085_p11 = scmp.lt.u32.totalorder %s1076_s12, %s1343_s8 }
  0x4c   : > { %p1084_p12 = por %p1083_p9, %p1082_p7 }
  0x4d   : > { %p1080_p5 = pneg %p1079_p3 }
  0x4e   : > { %p1086_p1 = por %p1085_p11, %p1084_p12 }
  0x50   : > { %p1087_p2 = pnand %p1086_p1, %p1080_p5 }
  0x52   : > { %1090 = shalt.err (!%p1087_p2)
}
  0x53   : > { %s1091_s30 = scalar_lea.vmem %s1345_s10, 2048  ;;  %s1182_s15 = smov [#allocation2]  }
  0x54   : > { %p1092_p6 = scmp.ne.s32.totalorder %s1345_s10, %s1091_s30  ;;  %s1096_s16 = sshll.u32 %s1182_s15, 4  ;;  %s1097_s16 = int_to_ptr.vmem [resolvable:$false] %s1096_s16 }
  0x55   : > { %s1098_s9 = scalar_lea.vmem %s1097_s16, 4096  ;;  %p1099_p3 = scmp.lt.s32.totalorder %s1345_s10, %s1097_s16 }
  0x56   : > { %p1094_p8 = pnand %p1092_p6, %p1078_p0  ;;  %p1100_p7 = scmp.lt.s32.totalorder %s1098_s9, %s1091_s30 }
  0x58   : > { %p1095_p13 = pneg %p1094_p8  ;;  %p1101_p9 = por %p1100_p7, %p1099_p3 }
  0x5a   : > { %p1102_p12 = pnand %p1101_p9, %p1095_p13 }
  0x5c   : > { %1105 = shalt.err (!%p1102_p12)
}
  0x5d   : > { %s1183_s12 = smov 128   ;;  %s1184_s13 = smov 8  }
  0x5e   : > { %953 = dma.hbm_to_vmem [thread:$0]  (!%p1347_p10), %s1343_s8, 2048, %s1345_s10, %s1351_s28, %s1183_s12, %s1183_s12, %s1184_s13  }
  0x5f   : > { %p1506_p0 = scmp.ne.s32.totalorder %s1501_s26, 0 }
  0x60   : > { %s1382_s29 = sand.u32 (!%p1506_p0), 1, %s1168_s19   ;;  %p1507_p5 = scmp.ne.s32.totalorder (!%p1506_p0), %s1499_s24, 0 }
  0x61   : > { %231 = sbr.rel (%p1506_p0) target bundleno = 621 (0x26d), region = 40  ;;  %s806_s17 = sshll.u32 (!%p1506_p0), %s1382_s29, 7 }
  0x62   : > { %s234_s7 = scalar_lea.sflag (!%p1506_p0), [#allocation3], %s1382_s29  ;;  %s1388_s6 = scalar_lea.vmem (!%p1506_p0), [#allocation2], %s806_s17 }
  0x68   : > { %1151 = dma.done.wait (%p1507_p5), %s234_s7, 2048  }
  0x69   : > { %1153 = vsyncadd (%p1507_p5), %s234_s7, 4294965248  ;;  %p1508_p10 = scmp.eq.s32.totalorder %s1239_s22, 0 }
  0x6b   : > { %1155 = dma.done.wait (%p1508_p10), [#allocation6], 2048   ;;  %p1509_p11 = pmov %p1508_p10 }
  0x6c   : > { %v1004_v0 = vld [vmem:[#allocation5] sm:$0xff]   ;;  %v1005_v1 = vld [vmem:[#allocation5 + $0x8] sm:$0xff]   ;;  %v1006_v2 = vld [vmem:[#allocation5 + $0x10] sm:$0xff]   ;;  %s1422_s11 = scalar_lea.vmem [#allocation8], %s806_s17  ;;  %s834_s28 = sshll.u32 %s1239_s22, 11 }
  0x6d   : > { %1157 = vsyncadd (%p1509_p11), [#allocation6], 4294965248  ;;  %867 = vmatprep.subr.bf16.mxu0 %v1004_v0  ;;  %v1007_v3 = vld [vmem:[#allocation5 + $0x18] sm:$0xff]   ;;  %v275_v4 = vld [vmem:[%s1388_s6] sm:$0xff]  ;;  %s705_s30 = sshll.u32 %s1422_s11, 4  ;;  %s1442_s9 = scalar_lea.hbm %s1495_s5, %s834_s28  ;;  %s1444_s30 = int_to_ptr.vmem [resolvable:$true] %s705_s30 }
  0x6e   : > { %868 = vmatpush3.bf16.msra.mxu0 %v1004_v0  ;;  %v276_v5 = vld [vmem:[%s1388_s6 + $0x8] sm:$0xff]  ;;  %v1008_v7 = vld [vmem:[#allocation5 + $0x20] sm:$0xff]   ;;  %v1014_v11 = vld [vmem:[#allocation7 + $0x10] sm:$0xff]   ;;  %s692_s22 = scalar_lea.sflag [#allocation4], %s1382_s29  ;;  %s1106_s12 = scalar_lea.vmem %s1444_s30, 2048 }
  0x6f   : > { %869 = vmatprep.subr.bf16.mxu0 %v1005_v1  ;;  %v308_v6 = vpack.c.bf16 %v276_v5, %v275_v4  ;;  %v1012_v8 = vld [vmem:[#allocation7] sm:$0xff]   ;;  %v1013_v9 = vld [vmem:[#allocation7 + $0x8] sm:$0xff]   ;;  %v1010_v12 = vld [vmem:[#allocation5 + $0x30] sm:$0xff]   ;;  %p1107_p1 = scmp.ne.s32.totalorder %s1444_s30, %s1106_s12  ;;  %s1185_s13 = smov [#allocation8]  }
  0x70   : > { %v1009_v10 = vld [vmem:[#allocation5 + $0x28] sm:$0xff]   ;;  %899 = vmatprep.subr.bf16.mxu1 %v1012_v8  ;;  %v1015_v13 = vld [vmem:[#allocation7 + $0x18] sm:$0xff]   ;;  %v1016_v15 = vld [vmem:[#allocation7 + $0x20] sm:$0xff]   ;;  %s1110_s17 = sshll.u32 %s1185_s13, 4  ;;  %s1111_s17 = int_to_ptr.vmem [resolvable:$false] %s1110_s17 }
  0x71   : > { %883 = vmatprep.mubr.bf16.mxu0 %v308_v6  ;;  %900 = vmatpush3.bf16.msra.mxu1 %v1012_v8  ;;  %v1011_v14 = vld [vmem:[#allocation5 + $0x38] sm:$0xff]   ;;  %v277_v16 = vld [vmem:[%s1388_s6 + $0x10] sm:$0xff]  ;;  %v279_v18 = vld [vmem:[%s1388_s6 + $0x20] sm:$0xff]  ;;  %p1108_p2 = pnand %p1107_p1, %p1330_p4  ;;  %s1112_s7 = scalar_lea.vmem %s1111_s17, 4096 }
  0x72   : > { %870 = vmatpush3.bf16.msra.mxu0 %v1005_v1  ;;  %901 = vmatprep.subr.bf16.mxu1 %v1013_v9  ;;  %v278_v17 = vld [vmem:[%s1388_s6 + $0x18] sm:$0xff]  ;;  %v280_v19 = vld [vmem:[%s1388_s6 + $0x28] sm:$0xff]  ;;  %v281_v23 = vld [vmem:[%s1388_s6 + $0x30] sm:$0xff]  ;;  %p1113_p8 = scmp.lt.s32.totalorder %s1444_s30, %s1111_s17  ;;  %p1114_p13 = scmp.lt.s32.totalorder %s1112_s7, %s1106_s12 }
  0x73   : > { %871 = vmatprep.subr.bf16.mxu0 %v1006_v2  ;;  %v309_v20 = vpack.c.bf16 %v278_v17, %v277_v16  ;;  %v1017_v21 = vld [vmem:[#allocation7 + $0x28] sm:$0xff]   ;;  %v310_v22 = vpack.c.bf16 %v280_v19, %v279_v18  ;;  %v282_v24 = vld [vmem:[%s1388_s6 + $0x38] sm:$0xff]  ;;  %v283_v25 = vld [vmem:[%s1388_s6 + $0x40] sm:$0xff]  ;;  %p1109_p6 = pneg %p1108_p2 }
  0x74   : > { %v284_v26 = vld [vmem:[%s1388_s6 + $0x48] sm:$0xff]  ;;  %v311_v27 = vpack.c.bf16 %v282_v24, %v281_v23  ;;  %v285_v29 = vld [vmem:[%s1388_s6 + $0x50] sm:$0xff]  ;;  %v286_v30 = vld [vmem:[%s1388_s6 + $0x58] sm:$0xff]  ;;  %p1115_p3 = por %p1114_p13, %p1113_p8 }
  0x75   : > { %902 = vmatpush3.bf16.msra.mxu1 %v1013_v9  ;;  %v312_v28 = vpack.c.bf16 %v284_v26, %v283_v25  ;;  %v287_v31 = vld [vmem:[%s1388_s6 + $0x60] sm:$0xff]  ;;  %v288_v32 = vld [vmem:[%s1388_s6 + $0x68] sm:$0xff]  ;;  %v313_v33 = vpack.c.bf16 %v286_v30, %v285_v29  ;;  %v289_v35 = vld [vmem:[%s1388_s6 + $0x70] sm:$0xff] }
  0x76   : > { %872 = vmatpush3.bf16.msra.mxu0 %v1006_v2  ;;  %903 = vmatprep.subr.bf16.mxu1 %v1014_v11  ;;  %v314_v34 = vpack.c.bf16 %v288_v32, %v287_v31  ;;  %v290_v36 = vld [vmem:[%s1388_s6 + $0x78] sm:$0xff]  ;;  %v1018_v38 = vld [vmem:[#allocation7 + $0x30] sm:$0xff]   ;;  %v810_v40 = vld [vmem:[%s1492_s2] ss:$0 sm:$0xff]  ;;  %p1116_p7 = pnand %p1115_p3, %p1109_p6 }
  0x77   : > { %873 = vmatprep.subr.bf16.mxu0 %v1007_v3  ;;  %v315_v37 = vpack.c.bf16 %v290_v36, %v289_v35  ;;  %v1019_v39 = vld [vmem:[#allocation7 + $0x38] sm:$0xff]  }
  0x79   : > { %904 = vmatpush3.bf16.msra.mxu1 %v1014_v11 }
  0x7a   : > { %874 = vmatpush3.bf16.msra.mxu0 %v1007_v3  ;;  %905 = vmatprep.subr.bf16.mxu1 %v1015_v13 }
  0x7b   : > { %875 = vmatprep.subr.bf16.mxu0 %v1008_v7 }
  0x7d   : > { %906 = vmatpush3.bf16.msra.mxu1 %v1015_v13 }
  0x7e   : > { %876 = vmatpush3.bf16.msra.mxu0 %v1008_v7  ;;  %907 = vmatprep.subr.bf16.mxu1 %v1016_v15 }
  0x7f   : > { %877 = vmatprep.subr.bf16.mxu0 %v1009_v10 }
  0x81   : > { %908 = vmatpush3.bf16.msra.mxu1 %v1016_v15 }
  0x82   : > { %878 = vmatpush3.bf16.msra.mxu0 %v1009_v10  ;;  %909 = vmatprep.subr.bf16.mxu1 %v1017_v21 }
  0x83   : > { %879 = vmatprep.subr.bf16.mxu0 %v1010_v12 }
  0x85   : > { %910 = vmatpush3.bf16.msra.mxu1 %v1017_v21 }
  0x86   : > { %880 = vmatpush3.bf16.msra.mxu0 %v1010_v12  ;;  %911 = vmatprep.subr.bf16.mxu1 %v1018_v38 }
  0x87   : > { %881 = vmatprep.subr.bf16.mxu0 %v1011_v14 }
  0x89   : > { %912 = vmatpush3.bf16.msra.mxu1 %v1018_v38 }
  0x8a   : > { %882 = vmatpush3.bf16.msra.mxu0 %v1011_v14  ;;  %913 = vmatprep.subr.bf16.mxu1 %v1019_v39 }
  0x8d   : > { %884 = vmatmul.mubr.bf16.vlgmr.msra.gmra.mrb[0].mxu0 %v309_v20  ;;  %914 = vmatpush3.bf16.msra.mxu1 %v1019_v39 }
  0x8e   : > { %887 = vmatprep.mubr.bf16.mxu0 %v310_v22 }
  0x95   : > { %888 = vmatmul.mubr.bf16.gmra.mrb[4].mxu0 %v311_v27 }
  0x96   : > { %891 = vmatprep.mubr.bf16.mxu0 %v312_v28 }
  0x9d   : > { %892 = vmatmul.mubr.bf16.gmra.mrb[8].mxu0 %v313_v33  ;;  %v819_v33 = vld [vmem:[%s1494_s4] ss:$0 sm:$0xff] }
  0x9e   : > { %895 = vmatprep.mubr.bf16.mxu0 %v314_v34 }
  0xa5   : > { %896 = vmatmul.mubr.bf16.gmra.mrb[12].mxu0 %v315_v37 }
 0x160   : > { %v885_v41 = vpop.f32.mrb[0].mxu0 }
 0x161   : > { %v413_v42 = vadd.f32 %v885_v41, %v810_v40  ;;  %v404_v43 = vpop.f32.mrb[1].mxu0 }
 0x162   : > { %v405_v44 = vadd.f32 %v810_v40, %v404_v43  ;;  %v886_v45 = vpop.f32.mrb[2].mxu0 }
 0x163   : > { %v416_v46 = vadd.f32 %v886_v45, %v810_v40  ;;  %v407_v47 = vpop.f32.mrb[3].mxu0  ;;  %v469_v49 = vmax.f32 %v413_v42, 0.0 }
 0x164   : > { %v408_v48 = vadd.f32 %v810_v40, %v407_v47  ;;  %v467_v51 = vmax.f32 %v405_v44, 0.0 }
 0x165   : > { %v470_v50 = vmax.f32 %v416_v46, 0.0 }
 0x166   : > { %v468_v52 = vmax.f32 %v408_v48, 0.0 }
 0x167   : > { %v501_v53 = vpack.c.bf16 %v470_v50, %v469_v49 }
 0x168   : > { %v889_v54 = vpop.f32.mrb[4].mxu0  ;;  %v500_v55 = vpack.c.bf16 %v468_v52, %v467_v51 }
 0x169   : > { %v429_v56 = vadd.f32 %v889_v54, %v810_v40  ;;  %v420_v57 = vpop.f32.mrb[5].mxu0 }
 0x16a   : > { %v421_v58 = vadd.f32 %v810_v40, %v420_v57  ;;  %v890_v59 = vpop.f32.mrb[6].mxu0  ;;  %915 = vmatprep.mubr.bf16.mxu1 %v500_v55 }
 0x16b   : > { %v432_v60 = vadd.f32 %v890_v59, %v810_v40  ;;  %v423_v61 = vpop.f32.mrb[7].mxu0  ;;  %916 = vmatmul.mubr.bf16.vlgmr.msra.gmra.mrb[0].mxu1 %v501_v53  ;;  %v473_v63 = vmax.f32 %v429_v56, 0.0 }
 0x16c   : > { %v424_v62 = vadd.f32 %v810_v40, %v423_v61  ;;  %v471_v1 = vmax.f32 %v421_v58, 0.0 }
 0x16d   : > { %v474_v0 = vmax.f32 %v432_v60, 0.0 }
 0x16e   : > { %v472_v2 = vmax.f32 %v424_v62, 0.0 }
 0x16f   : > { %v503_v3 = vpack.c.bf16 %v474_v0, %v473_v63 }
 0x170   : > { %v502_v4 = vpack.c.bf16 %v472_v2, %v471_v1  ;;  %v893_v5 = vpop.f32.mrb[8].mxu0 }
 0x171   : > { %v445_v6 = vadd.f32 %v893_v5, %v810_v40  ;;  %v436_v7 = vpop.f32.mrb[9].mxu0 }
 0x172   : > { %v437_v8 = vadd.f32 %v810_v40, %v436_v7  ;;  %v894_v9 = vpop.f32.mrb[10].mxu0  ;;  %919 = vmatprep.mubr.bf16.mxu1 %v502_v4 }
 0x173   : > { %v448_v10 = vadd.f32 %v894_v9, %v810_v40  ;;  %v439_v11 = vpop.f32.mrb[11].mxu0  ;;  %920 = vmatmul.mubr.bf16.gmra.mrb[4].mxu1 %v503_v3  ;;  %v477_v13 = vmax.f32 %v445_v6, 0.0 }
 0x174   : > { %v440_v12 = vadd.f32 %v810_v40, %v439_v11  ;;  %v475_v15 = vmax.f32 %v437_v8, 0.0 }
 0x175   : > { %v478_v14 = vmax.f32 %v448_v10, 0.0 }
 0x176   : > { %v476_v16 = vmax.f32 %v440_v12, 0.0 }
 0x177   : > { %v505_v17 = vpack.c.bf16 %v478_v14, %v477_v13 }
 0x178   : > { %v504_v18 = vpack.c.bf16 %v476_v16, %v475_v15  ;;  %v897_v19 = vpop.f32.mrb[12].mxu0 }
 0x179   : > { %v461_v20 = vadd.f32 %v897_v19, %v810_v40  ;;  %v452_v21 = vpop.f32.mrb[13].mxu0 }
 0x17a   : > { %v453_v22 = vadd.f32 %v810_v40, %v452_v21  ;;  %v898_v23 = vpop.f32.mrb[14].mxu0  ;;  %923 = vmatprep.mubr.bf16.mxu1 %v504_v18 }
 0x17b   : > { %v464_v24 = vadd.f32 %v898_v23, %v810_v40  ;;  %v455_v25 = vpop.f32.mrb[15].mxu0  ;;  %924 = vmatmul.mubr.bf16.gmra.mrb[8].mxu1 %v505_v17  ;;  %v481_v27 = vmax.f32 %v461_v20, 0.0 }
 0x17c   : > { %v456_v26 = vadd.f32 %v810_v40, %v455_v25  ;;  %v479_v29 = vmax.f32 %v453_v22, 0.0 }
 0x17d   : > { %v482_v28 = vmax.f32 %v464_v24, 0.0 }
 0x17e   : > { %v480_v30 = vmax.f32 %v456_v26, 0.0 }
 0x17f   : > { %v507_v31 = vpack.c.bf16 %v482_v28, %v481_v27 }
 0x180   : > { %v506_v32 = vpack.c.bf16 %v480_v30, %v479_v29 }
 0x182   : > { %927 = vmatprep.mubr.bf16.mxu1 %v506_v32 }
 0x183   : > { %928 = vmatmul.mubr.bf16.gmra.mrb[12].mxu1 %v507_v31 }
 0x23e   : > { %v917_v34 = vpop.f32.mrb[0].mxu1 }
 0x23f   : > { %v605_v35 = vadd.f32 %v917_v34, %v819_v33  ;;  %v596_v36 = vpop.f32.mrb[1].mxu1 }
 0x240   : > { %v597_v37 = vadd.f32 %v819_v33, %v596_v36  ;;  %v918_v38 = vpop.f32.mrb[2].mxu1 }
 0x241   : > { %v661_v39 = vmax.f32 %v605_v35, 0.0  ;;  %v608_v40 = vadd.f32 %v918_v38, %v819_v33  ;;  %v599_v41 = vpop.f32.mrb[3].mxu1 }
 0x242   : > { %v659_v42 = vmax.f32 %v597_v37, 0.0  ;;  %v600_v43 = vadd.f32 %v819_v33, %v599_v41 }
 0x243   : > { %677 = vst [vmem:[%s1422_s11 + $0x10] sm:$0xff] %v661_v39  ;;  %v662_v44 = vmax.f32 %v608_v40, 0.0 }
 0x244   : > { %675 = vst [vmem:[%s1422_s11] sm:$0xff] %v659_v42  ;;  %v660_v45 = vmax.f32 %v600_v43, 0.0 }
 0x245   : > { %678 = vst [vmem:[%s1422_s11 + $0x18] sm:$0xff] %v662_v44 }
 0x246   : > { %676 = vst [vmem:[%s1422_s11 + $0x8] sm:$0xff] %v660_v45  ;;  %v921_v46 = vpop.f32.mrb[4].mxu1 }
 0x247   : > { %v621_v47 = vadd.f32 %v921_v46, %v819_v33  ;;  %v612_v48 = vpop.f32.mrb[5].mxu1 }
 0x248   : > { %v613_v49 = vadd.f32 %v819_v33, %v612_v48  ;;  %v922_v50 = vpop.f32.mrb[6].mxu1 }
 0x249   : > { %v665_v51 = vmax.f32 %v621_v47, 0.0  ;;  %v624_v52 = vadd.f32 %v922_v50, %v819_v33  ;;  %v615_v53 = vpop.f32.mrb[7].mxu1 }
 0x24a   : > { %v663_v54 = vmax.f32 %v613_v49, 0.0  ;;  %v616_v55 = vadd.f32 %v819_v33, %v615_v53 }
 0x24b   : > { %681 = vst [vmem:[%s1422_s11 + $0x30] sm:$0xff] %v665_v51  ;;  %v666_v56 = vmax.f32 %v624_v52, 0.0 }
 0x24c   : > { %679 = vst [vmem:[%s1422_s11 + $0x20] sm:$0xff] %v663_v54  ;;  %v664_v57 = vmax.f32 %v616_v55, 0.0 }
 0x24d   : > { %682 = vst [vmem:[%s1422_s11 + $0x38] sm:$0xff] %v666_v56 }
 0x24e   : > { %680 = vst [vmem:[%s1422_s11 + $0x28] sm:$0xff] %v664_v57  ;;  %v925_v58 = vpop.f32.mrb[8].mxu1 }
 0x24f   : > { %v637_v59 = vadd.f32 %v925_v58, %v819_v33  ;;  %v628_v60 = vpop.f32.mrb[9].mxu1 }
 0x250   : > { %v629_v61 = vadd.f32 %v819_v33, %v628_v60  ;;  %v926_v62 = vpop.f32.mrb[10].mxu1 }
 0x251   : > { %v669_v63 = vmax.f32 %v637_v59, 0.0  ;;  %v640_v0 = vadd.f32 %v926_v62, %v819_v33  ;;  %v631_v1 = vpop.f32.mrb[11].mxu1 }
 0x252   : > { %v667_v2 = vmax.f32 %v629_v61, 0.0  ;;  %v632_v3 = vadd.f32 %v819_v33, %v631_v1 }
 0x253   : > { %685 = vst [vmem:[%s1422_s11 + $0x50] sm:$0xff] %v669_v63  ;;  %v670_v4 = vmax.f32 %v640_v0, 0.0 }
 0x254   : > { %683 = vst [vmem:[%s1422_s11 + $0x40] sm:$0xff] %v667_v2  ;;  %v668_v5 = vmax.f32 %v632_v3, 0.0 }
 0x255   : > { %686 = vst [vmem:[%s1422_s11 + $0x58] sm:$0xff] %v670_v4 }
 0x256   : > { %684 = vst [vmem:[%s1422_s11 + $0x48] sm:$0xff] %v668_v5  ;;  %v929_v6 = vpop.f32.mrb[12].mxu1 }
 0x257   : > { %v653_v7 = vadd.f32 %v929_v6, %v819_v33  ;;  %v644_v8 = vpop.f32.mrb[13].mxu1 }
 0x258   : > { %v645_v9 = vadd.f32 %v819_v33, %v644_v8  ;;  %v930_v10 = vpop.f32.mrb[14].mxu1 }
 0x259   : > { %v673_v11 = vmax.f32 %v653_v7, 0.0  ;;  %v656_v12 = vadd.f32 %v930_v10, %v819_v33  ;;  %v647_v13 = vpop.f32.mrb[15].mxu1 }
 0x25a   : > { %v671_v14 = vmax.f32 %v645_v9, 0.0  ;;  %v648_v15 = vadd.f32 %v819_v33, %v647_v13 }
 0x25b   : > { %689 = vst [vmem:[%s1422_s11 + $0x70] sm:$0xff] %v673_v11  ;;  %v674_v16 = vmax.f32 %v656_v12, 0.0 }
 0x25c   : > { %687 = vst [vmem:[%s1422_s11 + $0x60] sm:$0xff] %v671_v14  ;;  %v672_v17 = vmax.f32 %v648_v15, 0.0 }
 0x25d   : > { %690 = vst [vmem:[%s1422_s11 + $0x78] sm:$0xff] %v674_v16 }
 0x25e   : > { %688 = vst [vmem:[%s1422_s11 + $0x68] sm:$0xff] %v672_v17 }
 0x25f   : > { %1119 = shalt.err (!%p1116_p7)
}
 0x260   : > { %s1120_s6 = scalar_lea.hbm %s1442_s9, 2048  ;;  %s1124_s8 = scalar_lea.hbm %s1495_s5, 6144 }
 0x261   : > { %p1121_p9 = scmp.ne.s32.totalorder %s1442_s9, %s1120_s6  ;;  %p1125_p5 = scmp.lt.u32.totalorder %s1442_s9, %s1495_s5 }
 0x262   : > { %p1126_p10 = scmp.lt.u32.totalorder %s1124_s8, %s1120_s6  ;;  %p1128_p1 = scmp.lt.u32.totalorder %s1120_s6, %s1442_s9 }
 0x263   : > { %p1122_p12 = pnand %p1121_p9, %p1330_p4 }
 0x264   : > { %p1127_p11 = por %p1126_p10, %p1125_p5 }
 0x265   : > { %p1123_p0 = pneg %p1122_p12 }
 0x266   : > { %p1129_p2 = por %p1128_p1, %p1127_p11 }
 0x268   : > { %p1130_p6 = pnand %p1129_p2, %p1123_p0 }
 0x26a   : > { %1133 = shalt.err (!%p1130_p6)
}
 0x26b   : > { %s1186_s28 = smov 128   ;;  %s1187_s15 = smov 8  }
 0x26c   : > { %941 = dma.vmem_to_hbm [thread:$0]  (%p1330_p4), %s1444_s30, 2048, %s1442_s9, %s692_s22, %s1186_s28, %s1186_s28, %s1187_s15  }
 0x26d PF: > { %p963_p8 = scmp.ge.s32.totalorder %s1176_s21, 2  ;;  %s720_s16 = sand.u32 1, %s1164_s18  }
 0x26e   : > { %p1510_p13 = scmp.ne.s32.totalorder %s1500_s25, 0  ;;  %s721_s12 = scalar_lea.sflag [#allocation4], %s720_s16 }
 0x270   : > { %p955_p3 = pnand %p963_p8, %p1510_p13 }
 0x272   : > { %1159 = dma.done.wait (!%p955_p3), %s721_s12, 2048  }
 0x273   : > { %1161 = vsyncadd (!%p955_p3), %s721_s12, 4294965248  ;;  %p19_p7 = scmp.ge.s32.totalorder %s1320_s14, 5   ;;  %s1511_s18 = smov %s1168_s19 }
 0x274   : > { %s1512_s19 = smov %s1172_s20  ;;  %s1513_s20 = smov %s1336_s27 }
 0x275   : > { %s1514_s21 = smov %s1320_s14  ;;  %21 = sbr.rel (!%p19_p7) target bundleno = 6 (0x6), region = 93 }
 0x27c   :  { %726 = vsyncpa [#allocation3], 1 }
 0x27d   :  { %728 = vsyncpa [#allocation3 + $0x1], 1 }
 0x27e   :  { %729 = vsyncpa [#allocation6], 1 }
 0x27f   :  { %730 = vsyncpa [#allocation4], 1 }
 0x280   :  { %732 = vsyncpa [#allocation4 + $0x1], 1 }

</bundles_post_ra>
